<compile_context>
chip_gen: v5e
topology: v5e:2x2
jax: 0.10.0
libtpu: 0.0.40
codegen_flags: <defaults>
</compile_context>

<pallas_src>
import functools

import jax
import jax.numpy as jnp
from jax.experimental import pallas as pl
from jax.experimental.pallas import tpu as pltpu

BN_EPS = 1e-5


def _cfe_kernel(x_ref, wf_ref, bf_ref, w3t_ref, b3_ref, out_ref, *, W):
    # x_ref:   (1, C, L)   L = TILE_H * W (lane axis)
    # wf_ref:  (5, E, C)   BN-folded conv1+conv2 weights; tap k <-> W-offset k-2
    # bf_ref:  (E, 1)      fused bias (conv bias * bn_scale + bn_shift)
    # w3t_ref: (C, E)      1x1 conv3 weight, transposed
    # b3_ref:  (C, 1)
    # out_ref: (1, C, L)
    x = x_ref[0].astype(jnp.float32)                        # (C, L)
    C, L = x.shape
    # In-row column index of every lane position.  Each block starts at a row
    # boundary, so in-block position p sits at column p % W.
    col = jax.lax.broadcasted_iota(jnp.int32, (C, L), 1) % W

    def shifted(off):
        # y[:, p] = x[:, p + off] within the same W-row, 0 outside ('same' pad).
        if off == 0:
            return x
        r = jnp.roll(x, -off, axis=1)                       # circular lane shift
        if off > 0:
            return jnp.where(col < (W - off), r, 0.0)
        return jnp.where(col >= (-off), r, 0.0)

    # Fused conv1 + conv2 + BN: every tap accumulates into one (E, L) buffer,
    # seeded with the fused bias (no separate zero-init, no channel concat).
    y = bf_ref[...].astype(jnp.float32)                     # (E, 1) -> (E, L)
    for k, off in enumerate((-2, -1, 0, 1, 2)):
        y = y + jnp.dot(wf_ref[k].astype(jnp.float32), shifted(off),
                        preferred_element_type=jnp.float32)

    # ELU (alpha=1).  min() keeps exp() finite on the (discarded) positive branch.
    y = jnp.where(y > 0, y, jnp.exp(jnp.minimum(y, 0.0)) - 1.0)

    # conv3: 1x1 conv == (C, E) @ (E, L) matmul over the channel axis.
    out = jnp.dot(w3t_ref[...].astype(jnp.float32), y,
                  preferred_element_type=jnp.float32)       # (C, L)
    out = out + b3_ref[...].astype(jnp.float32)
    out_ref[0] = out.astype(out_ref.dtype)


def _pick_tile_h(H, W, max_lanes=8192):
    """Largest TILE_H dividing H whose lane extent TILE_H*W is a multiple of
    128 (lane-dense blocks) and <= max_lanes (bounded VMEM; fits comfortably
    on v7x's smaller VMEM).  Falls back to the full H, which is always a legal
    block (block dim == full array dim)."""
    best = None
    for th in range(1, H + 1):
        if H % th == 0 and (th * W) % 128 == 0 and th * W <= max_lanes:
            best = th
    return best if best is not None else H


def cfe_forward(x_nchw, params):
    """x_nchw: (B, C, H, W) float32.  Returns (B, C, H, W)."""
    B, C, H, W = x_nchw.shape
    (w1, b1, w2, b2, gamma, beta, mean, var, w3, b3) = params
    E2 = w1.shape[2]
    E = 2 * E2

    # ---- host-side (free) precompute: fold eval-mode BN into conv1/conv2 ----
    scale = gamma * jax.lax.rsqrt(var + BN_EPS)             # (E,)
    shift = beta - mean * scale                             # (E,)
    s1, s2 = scale[:E2], scale[E2:]
    # Fused weight (5, E, C): tap index k corresponds to W-offset k-2.
    # conv1 (kernel 3, offsets -1..1) fills rows 0..E2-1 at k=1..3;
    # conv2 (kernel 5, offsets -2..2) fills rows E2..E-1 at k=0..4.
    wf = jnp.zeros((5, E, C), jnp.float32)
    wf = wf.at[1:4, :E2, :].set(jnp.transpose(w1, (0, 2, 1)) * s1[None, :, None])
    wf = wf.at[:, E2:, :].set(jnp.transpose(w2, (0, 2, 1)) * s2[None, :, None])
    bf = (jnp.concatenate([b1 * s1, b2 * s2]) + shift).reshape(E, 1)
    w3t = w3.T                                              # (C, E)
    b3c = b3.reshape(C, 1)

    # ---- lane-dense layout: (B, C, H*W); pure reshape, no transpose/pad ----
    xf = x_nchw.reshape(B, C, H * W)
    tile_h = _pick_tile_h(H, W)
    L = tile_h * W
    grid = (B, H // tile_h)

    out = pl.pallas_call(
        functools.partial(_cfe_kernel, W=W),
        out_shape=jax.ShapeDtypeStruct((B, C, H * W), x_nchw.dtype),
        grid=grid,
        in_specs=[
            pl.BlockSpec((1, C, L), lambda b, h: (b, 0, h)),
            pl.BlockSpec((5, E, C), lambda b, h: (0, 0, 0)),
            pl.BlockSpec((E, 1), lambda b, h: (0, 0)),
            pl.BlockSpec((C, E), lambda b, h: (0, 0)),
            pl.BlockSpec((C, 1), lambda b, h: (0, 0)),
        ],
        out_specs=pl.BlockSpec((1, C, L), lambda b, h: (b, 0, h)),
        compiler_params=pltpu.CompilerParams(
            # Both grid axes are independent (no reduction) -> megacore split.
            dimension_semantics=("parallel", "parallel"),
            # Per-tile footprint (double-buffered I/O + f32 intermediates) is
            # well under 2 MiB for L <= 8192; 32 MiB is safe on v5e/v6e/v7x.
            vmem_limit_bytes=32 * 1024 * 1024,
        ),
    )(xf, wf, bf, w3t, b3c)

    return out.reshape(B, C, H, W)


def init_params(key, channels, E=16):
    E2 = E // 2
    ks = jax.random.split(key, 6)
    # conv1: torch weight (E/2, C, 1, 3) -> taps-first (3, C, E/2)
    w1 = jax.random.normal(ks[0], (3, channels, E2), jnp.float32) * 0.1
    b1 = jax.random.normal(ks[1], (E2,), jnp.float32) * 0.05
    # conv2: torch weight (E/2, C, 1, 5) -> (5, C, E/2)
    w2 = jax.random.normal(ks[2], (5, channels, E2), jnp.float32) * 0.1
    b2 = jax.random.normal(ks[3], (E2,), jnp.float32) * 0.05
    # BatchNorm2d(E): affine + running stats (eval mode)
    gamma = 1.0 + 0.01 * jnp.arange(E, dtype=jnp.float32)
    beta = 0.02 * jnp.arange(E, dtype=jnp.float32)
    mean = 0.01 * jnp.arange(E, dtype=jnp.float32)
    var = 1.0 + 0.05 * jnp.arange(E, dtype=jnp.float32)
    # conv3: torch weight (C, E, 1, 1) -> (E, C)
    w3 = jax.random.normal(ks[4], (E, channels), jnp.float32) * 0.1
    b3 = jax.random.normal(ks[5], (channels,), jnp.float32) * 0.05
    return (w1, b1, w2, b2, gamma, beta, mean, var, w3, b3)


def cfe_reference(x_nchw, params):
    """Pure-JAX reference (unfused math, no Pallas) for validation."""
    (w1, b1, w2, b2, gamma, beta, mean, var, w3, b3) = params
    B, C, H, W = x_nchw.shape
    x = jnp.transpose(x_nchw, (0, 2, 3, 1)).reshape(B * H, W, C)
    xpad = jnp.pad(x, ((0, 0), (2, 2), (0, 0)))
    y1 = sum(jnp.einsum('nwc,ce->nwe', xpad[:, t + 1:t + 1 + W, :], w1[t])
             for t in range(3)) + b1
    y2 = sum(jnp.einsum('nwc,ce->nwe', xpad[:, t:t + W, :], w2[t])
             for t in range(5)) + b2
    y = jnp.concatenate([y1, y2], axis=-1)
    y = (y - mean) * jax.lax.rsqrt(var + BN_EPS) * gamma + beta
    y = jnp.where(y > 0, y, jnp.exp(y) - 1.0)
    out = jnp.einsum('nwe,ec->nwc', y, w3) + b3
    return jnp.transpose(out.reshape(B, H, W, C), (0, 3, 1, 2))


if __name__ == "__main__":
    key = jax.random.PRNGKey(0)
    kx, kp = jax.random.split(key)

    B, C, H, W = 2, 4, 16, 16   # small shapes consistent with the module
    x = jax.random.normal(kx, (B, C, H, W), jnp.float32)
    params = init_params(kp, channels=C, E=16)

    out = cfe_forward(x, params)
    out = jax.block_until_ready(out)

    ref = cfe_reference(x, params)
    assert out.shape == (B, C, H, W)
    assert jnp.allclose(out, ref, atol=1e-4, rtol=1e-4)

    print("KERNEL_OK")
</pallas_src>

<mosaic_0001>
module attributes {stable_mosaic.version = 11 : i64} {
  func.func @_cfe_kernel(%arg0: i32, %arg1: i32, %arg2: memref<1x4x256xf32, #tpu.memory_space<vmem>>, %arg3: memref<5x16x4xf32, #tpu.memory_space<vmem>>, %arg4: memref<16x1xf32, #tpu.memory_space<vmem>>, %arg5: memref<4x16xf32, #tpu.memory_space<vmem>>, %arg6: memref<4x1xf32, #tpu.memory_space<vmem>>, %arg7: memref<1x4x256xf32, #tpu.memory_space<vmem>>) attributes {dimension_semantics = [#tpu.dimension_semantics<parallel>, #tpu.dimension_semantics<parallel>], iteration_bounds = array<i64: 2, 1>, scalar_prefetch = 0 : i64, scratch_operands = 0 : i64, tpu.core_type = #tpu.core_type<tc>, window_params = [{transform_indices = @transform_0, window_bounds = array<i64: 1, 4, 256>}, {pipeline_mode = #tpu.pipeline_mode<synchronous>, transform_indices = @transform_1, window_bounds = array<i64: 5, 16, 4>}, {pipeline_mode = #tpu.pipeline_mode<synchronous>, transform_indices = @transform_2, window_bounds = array<i64: 16, 1>}, {pipeline_mode = #tpu.pipeline_mode<synchronous>, transform_indices = @transform_3, window_bounds = array<i64: 4, 16>}, {pipeline_mode = #tpu.pipeline_mode<synchronous>, transform_indices = @transform_4, window_bounds = array<i64: 4, 1>}, {transform_indices = @transform_5, window_bounds = array<i64: 1, 4, 256>}]} {
    %c0 = arith.constant 0 : index
    %c0_0 = arith.constant 0 : index
    %c0_1 = arith.constant 0 : index
    %0 = vector.load %arg2[%c0, %c0_0, %c0_1] : memref<1x4x256xf32, #tpu.memory_space<vmem>>, vector<1x4x256xf32>
    %1 = vector.shape_cast %0 : vector<1x4x256xf32> to vector<4x256xf32>
    %2 = tpu.iota {dimensions = array<i32: 1>} : vector<4x256xi32>
    %c16_i32 = arith.constant 16 : i32
    %c0_i32 = arith.constant 0 : i32
    %3 = arith.cmpi eq, %c16_i32, %c0_i32 : i32
    %c1_i32 = arith.constant 1 : i32
    %4 = arith.select %3, %c1_i32, %c16_i32 : i32
    %5 = vector.broadcast %4 : i32 to vector<4x256xi32>
    %6 = arith.remsi %2, %5 : vector<4x256xi32>
    %c0_i32_2 = arith.constant 0 : i32
    %7 = vector.broadcast %c0_i32_2 : i32 to vector<4x256xi32>
    %8 = arith.cmpi ne, %6, %7 : vector<4x256xi32>
    %c0_i32_3 = arith.constant 0 : i32
    %9 = vector.broadcast %c0_i32_3 : i32 to vector<4x256xi32>
    %10 = arith.cmpi slt, %6, %9 : vector<4x256xi32>
    %c0_i32_4 = arith.constant 0 : i32
    %11 = arith.cmpi slt, %4, %c0_i32_4 : i32
    %12 = vector.broadcast %11 : i1 to vector<4x256xi1>
    %13 = vector.broadcast %12 : vector<4x256xi1> to vector<4x256xi1>
    %14 = arith.xori %10, %13 : vector<4x256xi1>
    %15 = arith.andi %14, %8 : vector<4x256xi1>
    %16 = vector.broadcast %4 : i32 to vector<4x256xi32>
    %17 = arith.addi %6, %16 : vector<4x256xi32>
    %18 = arith.select %15, %17, %6 : vector<4x256xi1>, vector<4x256xi32>
    %c0_5 = arith.constant 0 : index
    %c0_6 = arith.constant 0 : index
    %19 = vector.load %arg4[%c0_5, %c0_6] : memref<16x1xf32, #tpu.memory_space<vmem>>, vector<16x1xf32>
    %c0_7 = arith.constant 0 : index
    %c0_8 = arith.constant 0 : index
    %c0_9 = arith.constant 0 : index
    %20 = vector.load %arg3[%c0_7, %c0_8, %c0_9] : memref<5x16x4xf32, #tpu.memory_space<vmem>>, vector<1x16x4xf32>
    %21 = vector.shape_cast %20 : vector<1x16x4xf32> to vector<16x4xf32>
    %22 = vector.extract_strided_slice %1 {offsets = [0, 254], sizes = [4, 2], strides = [1, 1]} : vector<4x256xf32> to vector<4x2xf32>
    %23 = vector.extract_strided_slice %1 {offsets = [0, 0], sizes = [4, 254], strides = [1, 1]} : vector<4x256xf32> to vector<4x254xf32>
    %24 = tpu.concatenate %22, %23 in 1 : vector<4x2xf32>, vector<4x254xf32> -> vector<4x256xf32>
    %c2_i32 = arith.constant 2 : i32
    %25 = vector.broadcast %c2_i32 : i32 to vector<4x256xi32>
    %26 = arith.cmpi sge, %18, %25 : vector<4x256xi32>
    %cst = arith.constant 0.000000e+00 : f32
    %27 = vector.broadcast %cst : f32 to vector<4x256xf32>
    %28 = arith.select %26, %24, %27 : vector<4x256xi1>, vector<4x256xf32>
    %cst_10 = arith.constant dense<0.000000e+00> : vector<16x256xf32>
    %29 = tpu.matmul %21, %28, %cst_10 {dimension_numbers = #tpu.dot_dimension_numbers<[1], [0], [0], [1], [0, 0, 1, 1], [], []>} : vector<16x4xf32>, vector<4x256xf32>, vector<16x256xf32> -> vector<16x256xf32>
    %30 = vector.broadcast %19 : vector<16x1xf32> to vector<16x256xf32>
    %31 = arith.addf %30, %29 : vector<16x256xf32>
    %c1 = arith.constant 1 : index
    %c0_11 = arith.constant 0 : index
    %c0_12 = arith.constant 0 : index
    %32 = vector.load %arg3[%c1, %c0_11, %c0_12] : memref<5x16x4xf32, #tpu.memory_space<vmem>>, vector<1x16x4xf32>
    %33 = vector.shape_cast %32 : vector<1x16x4xf32> to vector<16x4xf32>
    %34 = vector.extract_strided_slice %1 {offsets = [0, 255], sizes = [4, 1], strides = [1, 1]} : vector<4x256xf32> to vector<4x1xf32>
    %35 = vector.extract_strided_slice %1 {offsets = [0, 0], sizes = [4, 255], strides = [1, 1]} : vector<4x256xf32> to vector<4x255xf32>
    %36 = tpu.concatenate %34, %35 in 1 : vector<4x1xf32>, vector<4x255xf32> -> vector<4x256xf32>
    %c1_i32_13 = arith.constant 1 : i32
    %37 = vector.broadcast %c1_i32_13 : i32 to vector<4x256xi32>
    %38 = arith.cmpi sge, %18, %37 : vector<4x256xi32>
    %cst_14 = arith.constant 0.000000e+00 : f32
    %39 = vector.broadcast %cst_14 : f32 to vector<4x256xf32>
    %40 = arith.select %38, %36, %39 : vector<4x256xi1>, vector<4x256xf32>
    %cst_15 = arith.constant dense<0.000000e+00> : vector<16x256xf32>
    %41 = tpu.matmul %33, %40, %cst_15 {dimension_numbers = #tpu.dot_dimension_numbers<[1], [0], [0], [1], [0, 0, 1, 1], [], []>} : vector<16x4xf32>, vector<4x256xf32>, vector<16x256xf32> -> vector<16x256xf32>
    %42 = arith.addf %31, %41 : vector<16x256xf32>
    %c2 = arith.constant 2 : index
    %c0_16 = arith.constant 0 : index
    %c0_17 = arith.constant 0 : index
    %43 = vector.load %arg3[%c2, %c0_16, %c0_17] : memref<5x16x4xf32, #tpu.memory_space<vmem>>, vector<1x16x4xf32>
    %44 = vector.shape_cast %43 : vector<1x16x4xf32> to vector<16x4xf32>
    %cst_18 = arith.constant dense<0.000000e+00> : vector<16x256xf32>
    %45 = tpu.matmul %44, %1, %cst_18 {dimension_numbers = #tpu.dot_dimension_numbers<[1], [0], [0], [1], [0, 0, 1, 1], [], []>} : vector<16x4xf32>, vector<4x256xf32>, vector<16x256xf32> -> vector<16x256xf32>
    %46 = arith.addf %42, %45 : vector<16x256xf32>
    %c3 = arith.constant 3 : index
    %c0_19 = arith.constant 0 : index
    %c0_20 = arith.constant 0 : index
    %47 = vector.load %arg3[%c3, %c0_19, %c0_20] : memref<5x16x4xf32, #tpu.memory_space<vmem>>, vector<1x16x4xf32>
    %48 = vector.shape_cast %47 : vector<1x16x4xf32> to vector<16x4xf32>
    %49 = vector.extract_strided_slice %1 {offsets = [0, 1], sizes = [4, 255], strides = [1, 1]} : vector<4x256xf32> to vector<4x255xf32>
    %50 = vector.extract_strided_slice %1 {offsets = [0, 0], sizes = [4, 1], strides = [1, 1]} : vector<4x256xf32> to vector<4x1xf32>
    %51 = tpu.concatenate %49, %50 in 1 : vector<4x255xf32>, vector<4x1xf32> -> vector<4x256xf32>
    %c15_i32 = arith.constant 15 : i32
    %52 = vector.broadcast %c15_i32 : i32 to vector<4x256xi32>
    %53 = arith.cmpi slt, %18, %52 : vector<4x256xi32>
    %cst_21 = arith.constant 0.000000e+00 : f32
    %54 = vector.broadcast %cst_21 : f32 to vector<4x256xf32>
    %55 = arith.select %53, %51, %54 : vector<4x256xi1>, vector<4x256xf32>
    %cst_22 = arith.constant dense<0.000000e+00> : vector<16x256xf32>
    %56 = tpu.matmul %48, %55, %cst_22 {dimension_numbers = #tpu.dot_dimension_numbers<[1], [0], [0], [1], [0, 0, 1, 1], [], []>} : vector<16x4xf32>, vector<4x256xf32>, vector<16x256xf32> -> vector<16x256xf32>
    %57 = arith.addf %46, %56 : vector<16x256xf32>
    %c4 = arith.constant 4 : index
    %c0_23 = arith.constant 0 : index
    %c0_24 = arith.constant 0 : index
    %58 = vector.load %arg3[%c4, %c0_23, %c0_24] : memref<5x16x4xf32, #tpu.memory_space<vmem>>, vector<1x16x4xf32>
    %59 = vector.shape_cast %58 : vector<1x16x4xf32> to vector<16x4xf32>
    %60 = vector.extract_strided_slice %1 {offsets = [0, 2], sizes = [4, 254], strides = [1, 1]} : vector<4x256xf32> to vector<4x254xf32>
    %61 = vector.extract_strided_slice %1 {offsets = [0, 0], sizes = [4, 2], strides = [1, 1]} : vector<4x256xf32> to vector<4x2xf32>
    %62 = tpu.concatenate %60, %61 in 1 : vector<4x254xf32>, vector<4x2xf32> -> vector<4x256xf32>
    %c14_i32 = arith.constant 14 : i32
    %63 = vector.broadcast %c14_i32 : i32 to vector<4x256xi32>
    %64 = arith.cmpi slt, %18, %63 : vector<4x256xi32>
    %cst_25 = arith.constant 0.000000e+00 : f32
    %65 = vector.broadcast %cst_25 : f32 to vector<4x256xf32>
    %66 = arith.select %64, %62, %65 : vector<4x256xi1>, vector<4x256xf32>
    %cst_26 = arith.constant dense<0.000000e+00> : vector<16x256xf32>
    %67 = tpu.matmul %59, %66, %cst_26 {dimension_numbers = #tpu.dot_dimension_numbers<[1], [0], [0], [1], [0, 0, 1, 1], [], []>} : vector<16x4xf32>, vector<4x256xf32>, vector<16x256xf32> -> vector<16x256xf32>
    %68 = arith.addf %57, %67 : vector<16x256xf32>
    %cst_27 = arith.constant 0.000000e+00 : f32
    %69 = vector.broadcast %cst_27 : f32 to vector<16x256xf32>
    %70 = arith.cmpf ogt, %68, %69 : vector<16x256xf32>
    %cst_28 = arith.constant 0.000000e+00 : f32
    %71 = vector.broadcast %cst_28 : f32 to vector<16x256xf32>
    %72 = arith.minimumf %68, %71 : vector<16x256xf32>
    %73 = math.exp %72 : vector<16x256xf32>
    %cst_29 = arith.constant 1.000000e+00 : f32
    %74 = vector.broadcast %cst_29 : f32 to vector<16x256xf32>
    %75 = arith.subf %73, %74 : vector<16x256xf32>
    %76 = arith.select %70, %68, %75 : vector<16x256xi1>, vector<16x256xf32>
    %c0_30 = arith.constant 0 : index
    %c0_31 = arith.constant 0 : index
    %77 = vector.load %arg5[%c0_30, %c0_31] : memref<4x16xf32, #tpu.memory_space<vmem>>, vector<4x16xf32>
    %cst_32 = arith.constant dense<0.000000e+00> : vector<4x256xf32>
    %78 = tpu.matmul %77, %76, %cst_32 {dimension_numbers = #tpu.dot_dimension_numbers<[1], [0], [0], [1], [0, 0, 1, 1], [], []>} : vector<4x16xf32>, vector<16x256xf32>, vector<4x256xf32> -> vector<4x256xf32>
    %c0_33 = arith.constant 0 : index
    %c0_34 = arith.constant 0 : index
    %79 = vector.load %arg6[%c0_33, %c0_34] : memref<4x1xf32, #tpu.memory_space<vmem>>, vector<4x1xf32>
    %80 = vector.broadcast %79 : vector<4x1xf32> to vector<4x256xf32>
    %81 = arith.addf %78, %80 : vector<4x256xf32>
    %c0_35 = arith.constant 0 : index
    %c0_36 = arith.constant 0 : index
    %c0_37 = arith.constant 0 : index
    %82 = vector.load %arg7[%c0_35, %c0_36, %c0_37] : memref<1x4x256xf32, #tpu.memory_space<vmem>>, vector<1x4x256xf32>
    %83 = vector.shape_cast %82 : vector<1x4x256xf32> to vector<4x256xf32>
    %84 = vector.shape_cast %81 : vector<4x256xf32> to vector<1x4x256xf32>
    tpu.vector_store %arg7[%c0_35, %c0_36, %c0_37], %84 {strides = array<i32>} : memref<1x4x256xf32, #tpu.memory_space<vmem>>, vector<1x4x256xf32>,
    return
  }
  func.func @transform_0(%arg0: i32, %arg1: i32) -> (i32, i32, i32) {
    %c0_i32 = arith.constant 0 : i32
    %c0_i32_0 = arith.constant 0 : i32
    return %arg0, %c0_i32, %arg1 : i32, i32, i32
  }
  func.func @transform_1(%arg0: i32, %arg1: i32) -> (i32, i32, i32) {
    %c0_i32 = arith.constant 0 : i32
    %c0_i32_0 = arith.constant 0 : i32
    %c0_i32_1 = arith.constant 0 : i32
    %c0_i32_2 = arith.constant 0 : i32
    return %c0_i32, %c0_i32_0, %c0_i32_1 : i32, i32, i32
  }
  func.func @transform_2(%arg0: i32, %arg1: i32) -> (i32, i32) {
    %c0_i32 = arith.constant 0 : i32
    %c0_i32_0 = arith.constant 0 : i32
    %c0_i32_1 = arith.constant 0 : i32
    return %c0_i32, %c0_i32_0 : i32, i32
  }
  func.func @transform_3(%arg0: i32, %arg1: i32) -> (i32, i32) {
    %c0_i32 = arith.constant 0 : i32
    %c0_i32_0 = arith.constant 0 : i32
    %c0_i32_1 = arith.constant 0 : i32
    return %c0_i32, %c0_i32_0 : i32, i32
  }
  func.func @transform_4(%arg0: i32, %arg1: i32) -> (i32, i32) {
    %c0_i32 = arith.constant 0 : i32
    %c0_i32_0 = arith.constant 0 : i32
    %c0_i32_1 = arith.constant 0 : i32
    return %c0_i32, %c0_i32_0 : i32, i32
  }
  func.func @transform_5(%arg0: i32, %arg1: i32) -> (i32, i32, i32) {
    %c0_i32 = arith.constant 0 : i32
    %c0_i32_0 = arith.constant 0 : i32
    return %arg0, %c0_i32, %arg1 : i32, i32, i32
  }
}

</mosaic_0001>

<bundles_post_ra>
// kernel: tpu_custom_call.1
= control target key start
LH: loop header
LB: loop body
LE: loop exit
PB: predicated region body
PF: predicated region fallthrough
CT: control target
= control target key end

     0   :  { %10 = vsyncpa [#allocation3], 0  ;;  %s1311_s0 = inlined_call_operand.vmem [shape: f32[2,4,256], index: 0, kind: input, shape index: {}]   ;;  %s1312_s1 = inlined_call_operand.vmem [shape: f32[5,16,4], index: 1, kind: input, shape index: {}]   ;;  %s1313_s2 = inlined_call_operand.vmem [shape: f32[16,1], index: 2, kind: input, shape index: {}]   ;;  %s1314_s3 = inlined_call_operand.vmem [shape: f32[4,16], index: 3, kind: input, shape index: {}]   ;;  %s1315_s4 = inlined_call_operand.vmem [shape: f32[4,1], index: 4, kind: input, shape index: {}]   ;;  %s1316_s5 = inlined_call_operand.hbm [shape: f32[2,4,256], index: 5, kind: output, shape index: {}]  }
   0x1   :  { %12 = vsyncpa [#allocation3 + $0x1], 0  ;;  %s1127_s18 = smov 0   ;;  %s1129_s19 = smov 0  }
   0x2   :  { %s1131_s20 = smov 0   ;;  %s1133_s21 = smov 0  }
   0x3   :  { %s1135_s22 = smov 0   ;;  %s1137_s23 = smov 0  }
   0x4 LB: > { %s882_s24 = sadd.s32 4294967295, %s1090_s23   ;;  %s883_s25 = sadd.s32 4294967294, %s1090_s23   ;;  %s1090_s23 = sphi %s1137_s23, %s18_s23   ;;  %s1086_s22 = sphi %s1135_s22, %s1323_s22   ;;  %s1082_s21 = sphi %s1133_s21, %s1322_s21   ;;  %s1078_s20 = sphi %s1131_s20, %s1321_s20   ;;  %s1074_s19 = sphi %s1129_s19, %s1320_s19   ;;  %s1070_s18 = sphi %s1127_s18, %s1319_s18  }
   0x5   : > { %s30_s26 = sadd.s32 1, %s1086_s22  ;;  %s151_s27 = sadd.s32 1, %s1078_s20 }
   0x6   : > { %p32_p0 = scmp.ge.s32.totalorder %s30_s26, 2  ;;  %p161_p1 = scmp.ne.s32.totalorder %s1078_s20, %s1074_s19 }
   0x7   : > { %p162_p2 = scmp.eq.s32.totalorder %s882_s24, 1  ;;  %p167_p3 = scmp.ne.s32.totalorder %s1074_s19, %s1070_s18 }
   0x8   : > { %s1325_s26 = smov (%p32_p0, %s30_s26), 0  ;;  %p168_p5 = scmp.eq.s32.totalorder %s883_s25, 1 }
   0x9   : > { %p1167_p4 = por %p162_p2, %p161_p1  ;;  %s146_s29 = ssub.s32 %s1086_s22, %s1325_s26 }
   0xa   : > { %p886_p6 = scmp.ge.s32.totalorder %s1090_s23, 1  ;;  %p149_p7 = scmp.eq.s32.totalorder %s146_s29, 0 }
   0xb   : > { %p1174_p8 = por %p168_p5, %p167_p3  ;;  %p211_p9 = scmp.lt.s32.totalorder %s1090_s23, 3 }
   0xc   : > { %s1180_s6 = scalar_select %p149_p7, %s1078_s20, %s151_s27  }
   0xd   : > { %p212_p10 = pnand %p886_p6, %p211_p9 }
   0xe   : > { %p244_p11 = scmp.lt.s32.totalorder (!%p212_p10), %s1082_s21, 1  ;;  %s1092_s12 = smov (!%p212_p10), 2  }
   0xf   : > { %215 = sbr.rel (%p212_p10) target bundleno = 508 (0x1fc), region = 40  ;;  %s1093_s13 = smov (!%p212_p10), 1  }
  0x10   : > { %s1094_s14 = smov (!%p212_p10), 127   ;;  %s1095_s15 = smov (!%p212_p10), 126  }
  0x11   : > { %s940_s16 = sshll.u32 (!%p212_p10), %s1082_s21, 3 }
  0x12   : > { %s801_s25 = scalar_lea.hbm (!%p212_p10), %s1316_s5, %s940_s16 }
  0x14   : > { %s245_s7 = scalar_select %p244_p11, %s1082_s21, 1  ;;  %v255_v15 = vlaneseq  ;;  %vm299_vm1 = vcmask 15360   ;;  %vm315_vm2 = vcmask 1043456   ;;  %v284_v24 = vld [vmem:[%s1312_s1] sm:$0xff]  ;;  %vm308_vm3 = vcmask 31744   ;;  %v285_v31 = vld [vmem:[%s1312_s1 + $0x8] sm:$0xff] }
  0x15   : > { %v1096_v26 = vmov 0   ;;  %v282_v27 = vld [vmem:[%s1313_s2] sm:$0xff]  ;;  %vm397_vm5 = vcmask 7168   ;;  %v283_v33 = vld [vmem:[%s1313_s2 + $0x8] sm:$0xff]  ;;  %v896_v36 = vld [vmem:[%s1312_s1 + $0x10] sm:$0xff]  ;;  %vm544_vm8 = vcmask 1039360  }
  0x16   : > { %s939_s8 = sshll.u32 %s245_s7, 3  ;;  %v256_v16 = vand.u32 127, %v255_v15  ;;  %1002 = vset.pattern.permute.xlu1 %v1096_v26  ;;  %1001 = vset.pattern.permute.xlu0 %v1096_v26  ;;  %v904_v40 = vld [vmem:[%s1312_s1 + $0x20] sm:$0xff]  ;;  %v897_v41 = vld [vmem:[%s1312_s1 + $0x18] sm:$0xff]  ;;  %v905_v42 = vld [vmem:[%s1312_s1 + $0x28] sm:$0xff]  ;;  %vm630_vm11 = vcmask 1031168  }
  0x17   : > { %s251_s11 = scalar_lea.vmem %s1311_s0, %s939_s8  ;;  %1003 = vset.pattern.permute.xlu2 %v1096_v26  ;;  %v912_v46 = vld [vmem:[%s1312_s1 + $0x30] sm:$0xff]  ;;  %v913_v50 = vld [vmem:[%s1312_s1 + $0x38] sm:$0xff]  ;;  %v920_v55 = vld [vmem:[%s1312_s1 + $0x40] sm:$0xff]  ;;  %s805_s7 = sshll.u32 %s801_s25, 4  ;;  %s806_s7 = int_to_ptr.hbm [resolvable:$true] %s805_s7 }
  0x18   : > { %v254_v0 = vld [vmem:[%s251_s11] sm:$0xff]  ;;  %v1187_v17 = vand.u32 15, %v256_v16  ;;  %v257_v18 = vadd.s32 128, %v256_v16  ;;  %v921_v59 = vld [vmem:[%s1312_s1 + $0x48] sm:$0xff]  ;;  %s1026_s8 = sshra.s32 %s806_s7, 4  ;;  %s1027_s8 = int_to_ptr.hbm [resolvable:$true] %s1026_s8 }
  0x19   : > { %287 = vst [vmem:[#allocation1] ss:$2 sm:$0xff] %v254_v0  ;;  %s1028_s9 = scalar_lea.hbm %s1027_s8, 8  ;;  %p1033_p1 = scmp.lt.s32.totalorder %s1027_s8, %s1316_s5 }
  0x1a   : > { %vm304_vm0 = vcmp.ge.s32.totalorder %v1187_v17, 2  ;;  %v1191_v23 = vand.u32 15, %v257_v18  ;;  %vm402_vm6 = vcmp.ge.s32.totalorder %v1187_v17, 1  ;;  %vm554_vm9 = vcmp.lt.s32.totalorder %v1187_v17, 15  ;;  %p1029_p12 = scmp.ne.s32.totalorder %s1027_s8, %s1028_s9 }
  0x1b   : > { %vm640_vm12 = vcmp.lt.s32.totalorder %v1187_v17, 14 }
  0x1c   : > { %vm305_vm4 = vcmp.ge.s32.totalorder %v1191_v23, 2  ;;  %vm403_vm7 = vcmp.ge.s32.totalorder %v1191_v23, 1  ;;  %vm555_vm10 = vcmp.lt.s32.totalorder %v1191_v23, 15  ;;  %vm641_vm13 = vcmp.lt.s32.totalorder %v1191_v23, 14  ;;  %p1030_p13 = pnand %p1029_p12, %p1167_p4 }
  0x1e   : > { %p1031_p0 = pneg %p1030_p13 }
  0x20   : > { %v288_v1 = vld.sshfl [vmem:[#allocation1 + $0x8] sm:$0xff pattern:$0x75316420] }
  0x21   : > { %292 = vst [vmem:[#allocation1] ss:$2 sm:$0xff] %v254_v0  ;;  %289 = vrot.lane.b32.xlu1 %v288_v1, %s1092_s12 }
  0x28   : > { %v293_v2 = vld.sshfl [vmem:[#allocation1] sm:$0xff pattern:$0x75316420]  ;;  %v294_v3 = vld.sshfl [vmem:[#allocation1 + $0x8] sm:$0xff pattern:$0x75316420] }
  0x29   : > { %295 = vrot.lane.b32.xlu0 %v293_v2, %s1092_s12  ;;  %385 = vst [vmem:[#allocation1] ss:$2 sm:$0xff] %v254_v0 }
  0x30   : > { %v386_v4 = vld.sshfl [vmem:[#allocation1 + $0x8] sm:$0xff pattern:$0x75316420] }
  0x31   : > { %297 = vrot.lane.b32.xlu0 %v294_v3, %s1092_s12  ;;  %390 = vst [vmem:[#allocation1] ss:$2 sm:$0xff] %v254_v0  ;;  %s1032_s12 = scalar_lea.hbm %s1316_s5, 16 }
  0x32   : > { %p1034_p2 = scmp.lt.s32.totalorder %s1032_s12, %s1028_s9 }
  0x34   : > { %p1035_p3 = por %p1034_p2, %p1033_p1 }
  0x36   : > { %p1036_p5 = pnand %p1035_p3, %p1031_p0 }
  0x38   : > { %v391_v5 = vld.sshfl [vmem:[#allocation1] sm:$0xff pattern:$0x75316420]  ;;  %v392_v6 = vld.sshfl [vmem:[#allocation1 + $0x8] sm:$0xff pattern:$0x75316420] }
  0x39   : > { %393 = vrot.lane.b32.xlu1 %v391_v5, %s1093_s13  ;;  %395 = vrot.lane.b32.xlu2 %v392_v6, %s1093_s13  ;;  %471 = vst [vmem:[#allocation1] ss:$2 sm:$0xff] %v254_v0 }
  0x40   : > { %v472_v7 = vld.sshfl [vmem:[#allocation1] sm:$0xff pattern:$0x75316420]  ;;  %v473_v8 = vld.sshfl [vmem:[#allocation1 + $0x8] sm:$0xff pattern:$0x75316420] }
  0x41   : > { %537 = vst [vmem:[#allocation1] ss:$2 sm:$0xff] %v254_v0  ;;  %387 = vrot.lane.b32.xlu2 %v386_v4, %s1093_s13 }
  0x48   : > { %v538_v9 = vld.sshfl [vmem:[#allocation1] sm:$0xff pattern:$0x75316420]  ;;  %v539_v10 = vld.sshfl [vmem:[#allocation1 + $0x8] sm:$0xff pattern:$0x75316420] }
  0x49   : > { %542 = vrot.lane.b32.xlu0 %v539_v10, %s1094_s14  ;;  %548 = vst [vmem:[#allocation1] ss:$2 sm:$0xff] %v254_v0  ;;  %540 = vrot.lane.b32.xlu2 %v538_v9, %s1094_s14 }
  0x50   : > { %v549_v11 = vld.sshfl [vmem:[#allocation1] sm:$0xff pattern:$0x75316420] }
  0x51   : > { %550 = vrot.lane.b32.xlu1 %v549_v11, %s1094_s14  ;;  %623 = vst [vmem:[#allocation1] ss:$2 sm:$0xff] %v254_v0  ;;  %s240_s14 = sand.u32 1, %s1074_s19  }
  0x52   : > { %s788_s21 = scalar_lea.sflag [#allocation3], %s240_s14 }
  0x58   : > { %v625_v12 = vld.sshfl [vmem:[#allocation1 + $0x8] sm:$0xff pattern:$0x75316420]  ;;  %v624_v13 = vld.sshfl [vmem:[#allocation1] sm:$0xff pattern:$0x75316420] }
  0x59   : > { %628 = vrot.lane.b32.xlu0 %v625_v12, %s1095_s15  ;;  %634 = vst [vmem:[#allocation1] ss:$2 sm:$0xff] %v254_v0  ;;  %626 = vrot.lane.b32.xlu2 %v624_v13, %s1095_s15 }
  0x60   : > { %v635_v14 = vld.sshfl [vmem:[#allocation1] sm:$0xff pattern:$0x75316420] }
  0x61   : > { %636 = vrot.lane.b32.xlu1 %v635_v14, %s1095_s15  ;;  %375 = vperm.xlu0 %1001, %v283_v33   ;;  %s887_s15 = sshll.u32 %s240_s14, 3 }
  0x62   : > { %s242_s27 = scalar_lea.vmem [#allocation2], %s887_s15 }
  0x63   : > { %s803_s29 = sshll.u32 %s242_s27, 4  ;;  %s804_s29 = int_to_ptr.vmem [resolvable:$true] %s803_s29 }
  0x69   : > { %370 = vperm.xlu1 %1002, %v282_v27  }
  0x93   : > { %v290_v20 = vpop.permute.xlu1 %289  ;;  %v396_v25 = vpop.permute.xlu2 %395 }
  0x9b   : > { %v296_v19 = vpop.permute.xlu0 %295  ;;  %v388_v32 = vpop.permute.xlu2 %387 }
  0x9c   : > { %v303_v21 = vsel %vm299_vm1, %v290_v20, %v296_v19 }
  0x9d   : > { %v306_v22 = vsel %vm304_vm0, %v303_v21, 0.0  ;;  %vm737_vm0 = vcmask 130048  }
  0x9e   : > { %890 = vmatpush.msk.msra.mxu0 %vm315_vm2, %v306_v22 }
  0x9f   : > { %891 = vmatmul.msk.f32.vlgmr.msra.gmra.mxu0 %vm308_vm3, %v284_v24 }
  0xa0   : > { %906 = vmatpush.msk.msrb.mxu0 %vm315_vm2, %v472_v7 }
  0xa3   : > { %v298_v28 = vpop.permute.xlu0 %297  ;;  %v541_v43 = vpop.permute.xlu2 %540 }
  0xa4   : > { %v300_v29 = vsel %vm299_vm1, %v296_v19, %v298_v28 }
  0xa5   : > { %v307_v30 = vsel %vm305_vm4, %v300_v29, 0.0 }
  0xa6   : > { %893 = vmatpush.msk.msra.mxu1 %vm315_vm2, %v307_v30 }
  0xa7   : > { %894 = vmatmul.msk.f32.vlgmr.msra.gmra.mxu1 %vm308_vm3, %v284_v24  ;;  %892 = vmatmul.msk.f32.gmra.mxu0 %vm308_vm3, %v285_v31  ;;  %v731_v24 = vld [vmem:[%s1315_s4] sm:$0xf] }
  0xa8   : > { %909 = vmatpush.msk.msrb.mxu1 %vm315_vm2, %v473_v8  ;;  %734 = vperm.xlu2 %1003, %v731_v24  }
  0xab   : > { %v394_v34 = vpop.permute.xlu1 %393 }
  0xac   : > { %v401_v35 = vsel %vm397_vm5, %v388_v32, %v394_v34  ;;  %v398_v37 = vsel %vm397_vm5, %v394_v34, %v396_v25 }
  0xad   : > { %v404_v38 = vsel %vm402_vm6, %v401_v35, 0.0  ;;  %v405_v39 = vsel %vm403_vm7, %v398_v37, 0.0 }
  0xae   : > { %898 = vmatpush.msk.msra.mxu2 %vm315_vm2, %v404_v38  ;;  %901 = vmatpush.msk.msra.mxu3 %vm315_vm2, %v405_v39 }
  0xaf   : > { %899 = vmatmul.msk.f32.vlgmr.msra.gmra.mxu2 %vm308_vm3, %v896_v36  ;;  %895 = vmatmul.msk.f32.gmra.mxu1 %vm308_vm3, %v285_v31 }
  0xb0   : > { %902 = vmatmul.msk.f32.vlgmr.msra.gmra.mxu3 %vm308_vm3, %v896_v36  ;;  %907 = vmatmul.msk.f32.vlgmr.msrb.gmra.mxu0 %vm308_vm3, %v904_v40 }
  0xb3   : > { %v627_v52 = vpop.permute.xlu2 %626 }
  0xb7   : > { %900 = vmatmul.msk.f32.gmra.mxu2 %vm308_vm3, %v897_v41  ;;  %910 = vmatmul.msk.f32.vlgmr.msrb.gmra.mxu1 %vm308_vm3, %v904_v40 }
  0xb8   : > { %903 = vmatmul.msk.f32.gmra.mxu3 %vm308_vm3, %v897_v41  ;;  %908 = vmatmul.msk.f32.gmra.mxu0 %vm308_vm3, %v905_v42 }
  0xbb   : > { %v543_v44 = vpop.permute.xlu0 %542 }
  0xbc   : > { %v545_v45 = vsel %vm544_vm8, %v541_v43, %v543_v44 }
  0xbd   : > { %v556_v47 = vsel %vm554_vm9, %v545_v45, 0.0 }
  0xbe   : > { %914 = vmatpush.msk.msrb.mxu2 %vm315_vm2, %v556_v47 }
  0xbf   : > { %915 = vmatmul.msk.f32.vlgmr.msrb.gmra.mxu2 %vm308_vm3, %v912_v46  ;;  %911 = vmatmul.msk.f32.gmra.mxu1 %vm308_vm3, %v905_v42 }
  0xc3   : > { %v551_v48 = vpop.permute.xlu1 %550 }
  0xc4   : > { %v553_v49 = vsel %vm544_vm8, %v543_v44, %v551_v48 }
  0xc5   : > { %v557_v51 = vsel %vm555_vm10, %v553_v49, 0.0 }
  0xc6   : > { %917 = vmatpush.msk.msrb.mxu3 %vm315_vm2, %v557_v51 }
  0xc7   : > { %916 = vmatmul.msk.f32.gmra.mxu2 %vm308_vm3, %v913_v50  ;;  %918 = vmatmul.msk.f32.vlgmr.msrb.gmra.mxu3 %vm308_vm3, %v912_v46 }
  0xcb   : > { %v629_v53 = vpop.permute.xlu0 %628 }
  0xcc   : > { %v631_v54 = vsel %vm630_vm11, %v627_v52, %v629_v53 }
  0xcd   : > { %v642_v56 = vsel %vm640_vm12, %v631_v54, 0.0 }
  0xce   : > { %922 = vmatpush.msk.msra.mxu0 %vm315_vm2, %v642_v56 }
  0xcf   : > { %919 = vmatmul.msk.f32.gmra.mxu3 %vm308_vm3, %v913_v50  ;;  %923 = vmatmul.msk.f32.vlgmr.msra.gmra.mxu0 %vm308_vm3, %v920_v55 }
  0xd3   : > { %v637_v57 = vpop.permute.xlu1 %636  ;;  %v376_v12 = vpop.permute.xlu0 %375 }
  0xd4   : > { %v639_v58 = vsel %vm630_vm11, %v629_v53, %v637_v57  ;;  %v730_v53 = vld [vmem:[%s1314_s3] sm:$0xf] }
  0xd5   : > { %v643_v60 = vsel %vm641_vm13, %v639_v58, 0.0 }
  0xd6   : > { %925 = vmatpush.msk.msra.mxu1 %vm315_vm2, %v643_v60 }
  0xd7   : > { %924 = vmatmul.msk.f32.gmra.mxu0 %vm308_vm3, %v921_v59  ;;  %926 = vmatmul.msk.f32.vlgmr.msra.gmra.mxu1 %vm308_vm3, %v920_v55 }
  0xdb   : > { %v371_v5 = vpop.permute.xlu1 %370 }
  0xdf   : > { %927 = vmatmul.msk.f32.gmra.mxu1 %vm308_vm3, %v921_v59 }
 0x11c   : > { %v339_v61 = vpop.f32.mrf.mxu0 }
 0x11d   : > { %v378_v6 = vadd.f32 %v371_v5, %v339_v61  ;;  %v735_v61 = vpop.permute.xlu2 %734 }
 0x124   : > { %v362_v62 = vpop.f32.mrf.mxu1  ;;  %v342_v63 = vpop.f32.mrf.mxu0 }
 0x125   : > { %v379_v13 = vadd.f32 %v371_v5, %v362_v62  ;;  %v380_v15 = vadd.f32 %v376_v12, %v342_v63 }
 0x12c   : > { %v365_v1 = vpop.f32.mrf.mxu1 }
 0x12d   : > { %v501_v2 = vpop.f32.mrf.mxu0  ;;  %v381_v26 = vadd.f32 %v376_v12, %v365_v1 }
 0x132   : > { %v435_v0 = vpop.f32.mrf.mxu2 }
 0x133   : > { %v458_v3 = vpop.f32.mrf.mxu3  ;;  %v464_v9 = vadd.f32 %v435_v0, %v378_v6 }
 0x134   : > { %v524_v7 = vpop.f32.mrf.mxu1  ;;  %v465_v19 = vadd.f32 %v458_v3, %v379_v13 }
 0x135   : > { %v504_v8 = vpop.f32.mrf.mxu0  ;;  %v530_v14 = vadd.f32 %v501_v2, %v464_v9 }
 0x136   : > { %v531_v25 = vadd.f32 %v524_v7, %v465_v19 }
 0x13a   : > { %v438_v4 = vpop.f32.mrf.mxu2 }
 0x13b   : > { %v461_v10 = vpop.f32.mrf.mxu3  ;;  %v466_v20 = vadd.f32 %v438_v4, %v380_v15 }
 0x13c   : > { %v527_v17 = vpop.f32.mrf.mxu1  ;;  %v467_v33 = vadd.f32 %v461_v10, %v381_v26 }
 0x13d   : > { %v532_v27 = vadd.f32 %v504_v8, %v466_v20 }
 0x13e   : > { %v533_v39 = vadd.f32 %v527_v17, %v467_v33 }
 0x142   : > { %v587_v11 = vpop.f32.mrf.mxu2 }
 0x143   : > { %v616_v16 = vadd.f32 %v587_v11, %v530_v14 }
 0x14a   : > { %v610_v22 = vpop.f32.mrf.mxu3  ;;  %v590_v23 = vpop.f32.mrf.mxu2 }
 0x14b   : > { %v618_v29 = vadd.f32 %v590_v23, %v532_v27  ;;  %v617_v30 = vadd.f32 %v610_v22, %v531_v25 }
 0x14c   : > { %v673_v18 = vpop.f32.mrf.mxu0 }
 0x14d   : > { %v702_v21 = vadd.f32 %v673_v18, %v616_v16 }
 0x14f   : > { %v710_v28 = vmin.f32 %v702_v21, 0.0  ;;  %vm706_vm15 = vcmp.gt.f32.partialorder %v702_v21, 0.0 }
 0x151   : > { %v714_v34 = vmul.f32 1.442695, %v710_v28 }
 0x152   : > { %v613_v38 = vpop.f32.mrf.mxu3 }
 0x153   : > { %1004 = vpow2.f32 %v714_v34  ;;  %v619_v42 = vadd.f32 %v613_v38, %v533_v39 }
 0x154   : > { %v676_v31 = vpop.f32.mrf.mxu0  ;;  %v696_v32 = vpop.f32.mrf.mxu1 }
 0x155   : > { %v704_v35 = vadd.f32 %v676_v31, %v618_v29  ;;  %v703_v36 = vadd.f32 %v696_v32, %v617_v30 }
 0x157   : > { %v712_v37 = vmin.f32 %v704_v35, 0.0  ;;  %v711_v41 = vmin.f32 %v703_v36, 0.0  ;;  %vm708_vm14 = vcmp.gt.f32.partialorder %v704_v35, 0.0  ;;  %vm707_vm3 = vcmp.gt.f32.partialorder %v703_v36, 0.0 }
 0x159   : > { %v718_v40 = vmul.f32 1.442695, %v712_v37  ;;  %v716_v44 = vmul.f32 1.442695, %v711_v41  ;;  %v1005_v46 = vpop.eup %1004 }
 0x15a   : > { %v928_v51 = vadd.f32 -1.0, %v1005_v46 }
 0x15b   : > { %1006 = vpow2.f32 %v718_v40 }
 0x15c   : > { %v699_v43 = vpop.f32.mrf.mxu1  ;;  %1008 = vpow2.f32 %v716_v44  ;;  %v726_v54 = vsel %vm706_vm15, %v702_v21, %v928_v51 }
 0x15d   : > { %v705_v45 = vadd.f32 %v699_v43, %v619_v42 }
 0x15f   : > { %v713_v47 = vmin.f32 %v705_v45, 0.0  ;;  %vm709_vm1 = vcmp.gt.f32.partialorder %v705_v45, 0.0 }
 0x161   : > { %v1007_v48 = vpop.eup %1006  ;;  %v720_v49 = vmul.f32 1.442695, %v713_v47 }
 0x162   : > { %v930_v50 = vadd.f32 -1.0, %v1007_v48  ;;  %v1009_v55 = vpop.eup %1008 }
 0x163   : > { %1010 = vpow2.f32 %v720_v49  ;;  %v929_v58 = vadd.f32 -1.0, %v1009_v55 }
 0x164   : > { %v728_v52 = vsel %vm708_vm14, %v704_v35, %v930_v50 }
 0x165   : > { %755 = vmatpush.msra.mxu2 %v728_v52  ;;  %v727_v60 = vsel %vm707_vm3, %v703_v36, %v929_v58 }
 0x167   : > { %756 = vmatpush.msra.mxu2 %v726_v54 }
 0x168   : > { %932 = vmatmul.msk.f32.vlgmr.msra.gmra.mxu2 %vm737_vm0, %v730_v53 }
 0x169   : > { %v1011_v56 = vpop.eup %1010 }
 0x16a   : > { %v931_v57 = vadd.f32 -1.0, %v1011_v56 }
 0x16c   : > { %v729_v59 = vsel %vm709_vm1, %v705_v45, %v931_v57 }
 0x16d   : > { %775 = vmatpush.msra.mxu3 %v729_v59 }
 0x16f   : > { %776 = vmatpush.msra.mxu3 %v727_v60 }
 0x170   : > { %933 = vmatmul.msk.f32.vlgmr.msra.gmra.mxu3 %vm737_vm0, %v730_v53 }
 0x1eb   : > { %v758_v63 = vpop.f32.mrf.mxu2 }
 0x1ec   : > { %v759_v2 = vadd.f32 %v758_v63, %v735_v61 }
 0x1f3   : > { %v778_v62 = vpop.f32.mrf.mxu3 }
 0x1f4   : > { %v779_v0 = vadd.f32 %v778_v62, %v735_v61 }
 0x1f6   : > { %v783_v1 = vrot.slane %v779_v0, 4 }
 0x1f8   : > { %v784_v3 = vsel %vm315_vm2, %v759_v2, %v783_v1 }
 0x1f9   : > { %786 = vst [vmem:[%s242_s27] sm:$0xff] %v784_v3 }
 0x1fa   : > { %1039 = shalt.err (!%p1036_p5)
}
 0x1fb   : > { %941 = dma.vmem_to_hbm [thread:$0]  (%p1167_p4), %s804_s29, 128, %s806_s7, %s788_s21  }
 0x1fc PF: > { %p947_p6 = scmp.ge.s32.totalorder %s1090_s23, 2  ;;  %s817_s14 = sand.u32 1, %s1070_s18  }
 0x1fd   : > { %s818_s16 = scalar_lea.sflag [#allocation3], %s817_s14 }
 0x1fe   : > { %p944_p7 = pnand %p947_p6, %p1174_p8 }
 0x200   : > { %p945_p9 = pneg %p944_p7 }
 0x202   : > { %1065 = dma.done.wait (%p945_p9), %s818_s16, 128  }
 0x203   : > { %1067 = vsyncadd (%p945_p9), %s818_s16, 4294967168  ;;  %s18_s23 = sadd.s32 1, %s1090_s23   ;;  %s1319_s18 = smov %s1074_s19 }
 0x204   : > { %p15_p10 = scmp.ge.s32.totalorder %s18_s23, 4   ;;  %s1320_s19 = smov %s1078_s20 }
 0x205   : > { %s1321_s20 = smov %s1180_s6  ;;  %s1322_s21 = smov %s1086_s22 }
 0x206   : > { %s1323_s22 = smov %s1325_s26  ;;  %17 = sbr.rel (!%p15_p10) target bundleno = 4 (0x4), region = 79 }
 0x20b   :  { %824 = vsyncpa [#allocation3], 1 }
 0x20c   :  { %826 = vsyncpa [#allocation3 + $0x1], 1 }

</bundles_post_ra>
